<compile_context>
chip_gen: v7x
topology: tpu7x:2x2x1
jax: 0.10.0
libtpu: 0.0.40
codegen_flags: <defaults>
</compile_context>

<pallas_src>
import jax
import jax.numpy as jnp
from jax.experimental import pallas as pl
from jax.experimental.pallas import tpu as pltpu


def lstm_recurrence_kernel(emb_ref, h0_ref, c0_ref, wih_ref, whh_ref, b_ref,
                           hs_ref, cT_ref):
    """Single-invocation LSTM: hoisted input projection + unrolled recurrence.

    emb_ref : (S*B, E)  embedded tokens, time-major rows (row = s*B + b), bf16
    h0/c0   : (B, H)    initial state, f32
    wih     : (E, 4H)   bf16 storage, PyTorch gate order [i, f, g, o]
    whh     : (H, 4H)   bf16 storage
    b       : (1, 4H)   f32, b_ih + b_hh pre-summed
    hs_ref  : (B, S*H)  all hidden states, lane-dense layout, written ONCE
    cT_ref  : (B, H)    final cell state, written once
    """
    SB = emb_ref.shape[0]
    B, H = h0_ref.shape
    S = SB // B

    # Upcast once; every dot is F32 x F32 -> F32 (avoids the unsupported
    # BF16xBF16=F32 dot, works on MXU and on the interpret/CPU path).
    w_ih = wih_ref[...].astype(jnp.float32)
    w_hh = whh_ref[...].astype(jnp.float32)
    emb = emb_ref[...].astype(jnp.float32)

    # --- Hoisted input projection: ONE big matmul in the prologue. ---
    ih_all = (jnp.dot(emb, w_ih, preferred_element_type=jnp.float32)
              + b_ref[...])                                     # (S*B, 4H) f32

    h = h0_ref[...]                                             # (B, H) f32
    c = c0_ref[...]

    # --- Unrolled recurrence: only h_{t-1} @ W_hh remains in the loop. ---
    # S is small and static here; for large S switch to lax.fori_loop with
    # ih_all staged in a VMEM scratch and a modest unroll factor.
    h_steps = []
    for t in range(S):
        gates = (ih_all[t * B:(t + 1) * B, :]
                 + jnp.dot(h, w_hh, preferred_element_type=jnp.float32))
        sg = jax.nn.sigmoid(gates)       # 4H = 128 lanes -> one vreg wide
        i_g = sg[:, 0 * H:1 * H]
        f_g = sg[:, 1 * H:2 * H]
        o_g = sg[:, 3 * H:4 * H]
        g_g = jnp.tanh(gates[:, 2 * H:3 * H])
        c = f_g * c + i_g * g_g                                 # f32 carries
        h = o_g * jnp.tanh(c)
        h_steps.append(h)                                       # stays in vregs

    # ONE lane-dense store: (B, S*H), last dim = 256 = 2 * 128 lanes.
    hs_ref[...] = jnp.concatenate(h_steps, axis=1)
    # Final cell state written exactly once; h_T is sliced from hs in wrapper.
    cT_ref[...] = c


@jax.jit
def rnn_forward(x_tokens, h0, c0, params):
    """Pallas implementation of RNNModule.forward.

    x_tokens : (B, S) int32
    h0, c0   : (1, B, H) float32 (PyTorch LSTM state convention)
    returns  : logits (B, S, V), (h_T, c_T) each (1, B, H)
    """
    emb_tbl, w_ih, w_hh, b_gates, w_dense, b_dense = params
    B, S = x_tokens.shape
    V, E = emb_tbl.shape
    H = h0.shape[-1]

    # Glue: embedding gather, time-major flat rows (row = s*B + b), bf16 so the
    # largest kernel input DMAs at half width.
    # NOTE: jnp.take clamps out-of-range ids (PyTorch nn.Embedding would raise).
    tok_sb = jnp.transpose(x_tokens, (1, 0)).reshape(S * B)
    emb2d = jnp.take(emb_tbl, tok_sb, axis=0).astype(jnp.bfloat16)  # (S*B, E)

    h0_2d = h0[0]                                               # (B, H)
    c0_2d = c0[0]

    grid_spec = pltpu.PrefetchScalarGridSpec(
        num_scalar_prefetch=0,
        grid=(1,),   # whole problem resident in VMEM; recurrence unrolled in-kernel
        in_specs=[
            pl.BlockSpec((S * B, E), lambda i: (0, 0)),         # embedded tokens (bf16)
            pl.BlockSpec((B, H), lambda i: (0, 0)),             # h0
            pl.BlockSpec((B, H), lambda i: (0, 0)),             # c0
            pl.BlockSpec((E, 4 * H), lambda i: (0, 0)),         # W_ih (bf16)
            pl.BlockSpec((H, 4 * H), lambda i: (0, 0)),         # W_hh (bf16)
            pl.BlockSpec((1, 4 * H), lambda i: (0, 0)),         # b_ih + b_hh
        ],
        out_specs=[
            pl.BlockSpec((B, S * H), lambda i: (0, 0)),         # hidden states (lane-dense)
            pl.BlockSpec((B, H), lambda i: (0, 0)),             # c_T
        ],
    )

    hs_bsh, c_T = pl.pallas_call(
        lstm_recurrence_kernel,
        out_shape=(
            jax.ShapeDtypeStruct((B, S * H), jnp.float32),
            jax.ShapeDtypeStruct((B, H), jnp.float32),
        ),
        grid_spec=grid_spec,
        compiler_params=pltpu.CompilerParams(
            dimension_semantics=("arbitrary",),   # sequential recurrence
        ),
    )(emb2d, h0_2d, c0_2d, w_ih, w_hh, b_gates)

    # h_T is exactly the last H-lane slice of the hidden slab.
    h_T = hs_bsh[:, (S - 1) * H:]

    # Hoisted vocab projection: ONE large lane-dense matmul over all S*B rows,
    # emitted directly in batch-first (B, S, V) layout. f32 x f32 dot.
    hs = hs_bsh.reshape(B, S, H)
    logits = (jnp.einsum("bsh,hv->bsv", hs, w_dense.astype(jnp.float32),
                         preferred_element_type=jnp.float32)
              + b_dense)                                        # (B, S, V)

    return logits, (h_T[None], c_T[None])


def rnn_forward_ref(x_tokens, h0, c0, params):
    """Pure-JAX reference (same bf16-storage / f32-dot recipe)."""
    emb_tbl, w_ih, w_hh, b_gates, w_dense, b_dense = params
    H = h0.shape[-1]
    emb = (jnp.take(emb_tbl, x_tokens, axis=0)
           .astype(jnp.bfloat16).astype(jnp.float32))           # (B, S, E)
    w_ih_f = w_ih.astype(jnp.float32)
    w_hh_f = w_hh.astype(jnp.float32)
    ih = (jnp.einsum("bse,ef->bsf", emb, w_ih_f,
                     preferred_element_type=jnp.float32) + b_gates)

    def step(carry, ih_t):
        h, c = carry
        gates = ih_t + jnp.dot(h, w_hh_f, preferred_element_type=jnp.float32)
        i_g = jax.nn.sigmoid(gates[:, 0 * H:1 * H])
        f_g = jax.nn.sigmoid(gates[:, 1 * H:2 * H])
        g_g = jnp.tanh(gates[:, 2 * H:3 * H])
        o_g = jax.nn.sigmoid(gates[:, 3 * H:4 * H])
        c = f_g * c + i_g * g_g
        h = o_g * jnp.tanh(c)
        return (h, c), h

    (hT, cT), hs = jax.lax.scan(step, (h0[0], c0[0]),
                                jnp.transpose(ih, (1, 0, 2)))   # scan over S
    logits = (jnp.einsum("sbh,hv->bsv", hs, w_dense.astype(jnp.float32),
                         preferred_element_type=jnp.float32) + b_dense)
    return logits, (hT[None], cT[None])


def init_params(key, n_vocab, embedding_size, lstm_size):
    """Deterministic synthetic parameters matching the PyTorch module's shapes.

    Matmul weights are *stored* bf16 (halves weight DMA); all dots are done in
    f32 after an in-kernel upcast.  Biases / embedding table / carries are f32.
    """
    k = jax.random.split(key, 6)
    scale = 0.1
    emb_tbl = scale * jax.random.normal(k[0], (n_vocab, embedding_size), jnp.float32)
    # PyTorch stores W_ih as (4H, E); we keep the transposed (E, 4H) layout for
    # right-multiplication on the MXU. Gate order i, f, g, o is preserved.
    w_ih = (scale * jax.random.normal(k[1], (embedding_size, 4 * lstm_size),
                                      jnp.float32)).astype(jnp.bfloat16)
    w_hh = (scale * jax.random.normal(k[2], (lstm_size, 4 * lstm_size),
                                      jnp.float32)).astype(jnp.bfloat16)
    b_gates = scale * jax.random.normal(k[3], (1, 4 * lstm_size), jnp.float32)  # b_ih+b_hh
    w_dense = (scale * jax.random.normal(k[4], (lstm_size, n_vocab),
                                         jnp.float32)).astype(jnp.bfloat16)
    b_dense = scale * jax.random.normal(k[5], (1, n_vocab), jnp.float32)
    return emb_tbl, w_ih, w_hh, b_gates, w_dense, b_dense


if __name__ == "__main__":
    n_vocab = 256
    seq_size = 8
    embedding_size = 32
    lstm_size = 32
    batch = 2

    key = jax.random.PRNGKey(0)
    kp, kx = jax.random.split(key)
    params = init_params(kp, n_vocab, embedding_size, lstm_size)

    x = jax.random.randint(kx, (batch, seq_size), 0, n_vocab, dtype=jnp.int32)
    # zero_state(batch) equivalent
    h0 = jnp.zeros((1, batch, lstm_size), jnp.float32)
    c0 = jnp.zeros((1, batch, lstm_size), jnp.float32)

    logits, (h_T, c_T) = rnn_forward(x, h0, c0, params)
    jax.block_until_ready((logits, h_T, c_T))

    assert logits.shape == (batch, seq_size, n_vocab)
    assert h_T.shape == (1, batch, lstm_size)
    assert c_T.shape == (1, batch, lstm_size)

    # Correctness check against a pure-JAX reference.
    ref_logits, (ref_h, ref_c) = rnn_forward_ref(x, h0, c0, params)
    assert float(jnp.max(jnp.abs(logits - ref_logits))) < 5e-2
    assert float(jnp.max(jnp.abs(h_T - ref_h))) < 5e-2
    assert float(jnp.max(jnp.abs(c_T - ref_c))) < 5e-2

    print("KERNEL_OK")
</pallas_src>

<mosaic_0001>
module attributes {stable_mosaic.version = 11 : i64} {
  func.func @lstm_recurrence_kernel(%arg0: i32, %arg1: memref<16x32xbf16, #tpu.memory_space<vmem>>, %arg2: memref<2x32xf32, #tpu.memory_space<vmem>>, %arg3: memref<2x32xf32, #tpu.memory_space<vmem>>, %arg4: memref<32x128xbf16, #tpu.memory_space<vmem>>, %arg5: memref<32x128xbf16, #tpu.memory_space<vmem>>, %arg6: memref<1x128xf32, #tpu.memory_space<vmem>>, %arg7: memref<2x256xf32, #tpu.memory_space<vmem>>, %arg8: memref<2x32xf32, #tpu.memory_space<vmem>>) attributes {dimension_semantics = [#tpu.dimension_semantics<arbitrary>], iteration_bounds = array<i64: 1>, scalar_prefetch = 0 : i64, scratch_operands = 0 : i64, tpu.core_type = #tpu.core_type<tc>, window_params = [{pipeline_mode = #tpu.pipeline_mode<synchronous>, transform_indices = @transform_0, window_bounds = array<i64: 16, 32>}, {pipeline_mode = #tpu.pipeline_mode<synchronous>, transform_indices = @transform_1, window_bounds = array<i64: 2, 32>}, {pipeline_mode = #tpu.pipeline_mode<synchronous>, transform_indices = @transform_2, window_bounds = array<i64: 2, 32>}, {pipeline_mode = #tpu.pipeline_mode<synchronous>, transform_indices = @transform_3, window_bounds = array<i64: 32, 128>}, {pipeline_mode = #tpu.pipeline_mode<synchronous>, transform_indices = @transform_4, window_bounds = array<i64: 32, 128>}, {pipeline_mode = #tpu.pipeline_mode<synchronous>, transform_indices = @transform_5, window_bounds = array<i64: 1, 128>}, {pipeline_mode = #tpu.pipeline_mode<synchronous>, transform_indices = @transform_6, window_bounds = array<i64: 2, 256>}, {pipeline_mode = #tpu.pipeline_mode<synchronous>, transform_indices = @transform_7, window_bounds = array<i64: 2, 32>}]} {
    %c0 = arith.constant 0 : index
    %c0_0 = arith.constant 0 : index
    %0 = vector.load %arg4[%c0, %c0_0] : memref<32x128xbf16, #tpu.memory_space<vmem>>, vector<32x128xbf16>
    %1 = arith.extf %0 : vector<32x128xbf16> to vector<32x128xf32>
    %c0_1 = arith.constant 0 : index
    %c0_2 = arith.constant 0 : index
    %2 = vector.load %arg5[%c0_1, %c0_2] : memref<32x128xbf16, #tpu.memory_space<vmem>>, vector<32x128xbf16>
    %3 = arith.extf %2 : vector<32x128xbf16> to vector<32x128xf32>
    %c0_3 = arith.constant 0 : index
    %c0_4 = arith.constant 0 : index
    %4 = vector.load %arg1[%c0_3, %c0_4] : memref<16x32xbf16, #tpu.memory_space<vmem>>, vector<16x32xbf16>
    %5 = arith.extf %4 : vector<16x32xbf16> to vector<16x32xf32>
    %cst = arith.constant dense<0.000000e+00> : vector<16x128xf32>
    %6 = tpu.matmul %5, %1, %cst {dimension_numbers = #tpu.dot_dimension_numbers<[1], [0], [0], [1], [0, 0, 1, 1], [], []>} : vector<16x32xf32>, vector<32x128xf32>, vector<16x128xf32> -> vector<16x128xf32>
    %c0_5 = arith.constant 0 : index
    %c0_6 = arith.constant 0 : index
    %7 = vector.load %arg6[%c0_5, %c0_6] : memref<1x128xf32, #tpu.memory_space<vmem>>, vector<1x128xf32>
    %8 = vector.broadcast %7 : vector<1x128xf32> to vector<16x128xf32>
    %9 = arith.addf %6, %8 : vector<16x128xf32>
    %c0_7 = arith.constant 0 : index
    %c0_8 = arith.constant 0 : index
    %10 = vector.load %arg2[%c0_7, %c0_8] : memref<2x32xf32, #tpu.memory_space<vmem>>, vector<2x32xf32>
    %c0_9 = arith.constant 0 : index
    %c0_10 = arith.constant 0 : index
    %11 = vector.load %arg3[%c0_9, %c0_10] : memref<2x32xf32, #tpu.memory_space<vmem>>, vector<2x32xf32>
    %12 = vector.extract_strided_slice %9 {offsets = [0, 0], sizes = [2, 128], strides = [1, 1]} : vector<16x128xf32> to vector<2x128xf32>
    %cst_11 = arith.constant dense<0.000000e+00> : vector<2x128xf32>
    %13 = tpu.matmul %10, %3, %cst_11 {dimension_numbers = #tpu.dot_dimension_numbers<[1], [0], [0], [1], [0, 0, 1, 1], [], []>} : vector<2x32xf32>, vector<32x128xf32>, vector<2x128xf32> -> vector<2x128xf32>
    %14 = arith.addf %12, %13 : vector<2x128xf32>
    %15 = arith.negf %14 : vector<2x128xf32>
    %16 = math.exp %15 : vector<2x128xf32>
    %cst_12 = arith.constant 1.000000e+00 : f32
    %17 = vector.broadcast %cst_12 : f32 to vector<2x128xf32>
    %18 = arith.addf %17, %16 : vector<2x128xf32>
    %19 = arith.divf %17, %18 : vector<2x128xf32>
    %20 = vector.extract_strided_slice %19 {offsets = [0, 0], sizes = [2, 32], strides = [1, 1]} : vector<2x128xf32> to vector<2x32xf32>
    %21 = vector.extract_strided_slice %19 {offsets = [0, 32], sizes = [2, 32], strides = [1, 1]} : vector<2x128xf32> to vector<2x32xf32>
    %22 = vector.extract_strided_slice %19 {offsets = [0, 96], sizes = [2, 32], strides = [1, 1]} : vector<2x128xf32> to vector<2x32xf32>
    %23 = vector.extract_strided_slice %14 {offsets = [0, 64], sizes = [2, 32], strides = [1, 1]} : vector<2x128xf32> to vector<2x32xf32>
    %24 = math.tanh %23 : vector<2x32xf32>
    %25 = arith.mulf %21, %11 : vector<2x32xf32>
    %26 = arith.mulf %20, %24 : vector<2x32xf32>
    %27 = arith.addf %25, %26 : vector<2x32xf32>
    %28 = math.tanh %27 : vector<2x32xf32>
    %29 = arith.mulf %22, %28 : vector<2x32xf32>
    %30 = vector.extract_strided_slice %9 {offsets = [2, 0], sizes = [2, 128], strides = [1, 1]} : vector<16x128xf32> to vector<2x128xf32>
    %cst_13 = arith.constant dense<0.000000e+00> : vector<2x128xf32>
    %31 = tpu.matmul %29, %3, %cst_13 {dimension_numbers = #tpu.dot_dimension_numbers<[1], [0], [0], [1], [0, 0, 1, 1], [], []>} : vector<2x32xf32>, vector<32x128xf32>, vector<2x128xf32> -> vector<2x128xf32>
    %32 = arith.addf %30, %31 : vector<2x128xf32>
    %33 = arith.negf %32 : vector<2x128xf32>
    %34 = math.exp %33 : vector<2x128xf32>
    %cst_14 = arith.constant 1.000000e+00 : f32
    %35 = vector.broadcast %cst_14 : f32 to vector<2x128xf32>
    %36 = arith.addf %35, %34 : vector<2x128xf32>
    %37 = arith.divf %35, %36 : vector<2x128xf32>
    %38 = vector.extract_strided_slice %37 {offsets = [0, 0], sizes = [2, 32], strides = [1, 1]} : vector<2x128xf32> to vector<2x32xf32>
    %39 = vector.extract_strided_slice %37 {offsets = [0, 32], sizes = [2, 32], strides = [1, 1]} : vector<2x128xf32> to vector<2x32xf32>
    %40 = vector.extract_strided_slice %37 {offsets = [0, 96], sizes = [2, 32], strides = [1, 1]} : vector<2x128xf32> to vector<2x32xf32>
    %41 = vector.extract_strided_slice %32 {offsets = [0, 64], sizes = [2, 32], strides = [1, 1]} : vector<2x128xf32> to vector<2x32xf32>
    %42 = math.tanh %41 : vector<2x32xf32>
    %43 = arith.mulf %39, %27 : vector<2x32xf32>
    %44 = arith.mulf %38, %42 : vector<2x32xf32>
    %45 = arith.addf %43, %44 : vector<2x32xf32>
    %46 = math.tanh %45 : vector<2x32xf32>
    %47 = arith.mulf %40, %46 : vector<2x32xf32>
    %48 = vector.extract_strided_slice %9 {offsets = [4, 0], sizes = [2, 128], strides = [1, 1]} : vector<16x128xf32> to vector<2x128xf32>
    %cst_15 = arith.constant dense<0.000000e+00> : vector<2x128xf32>
    %49 = tpu.matmul %47, %3, %cst_15 {dimension_numbers = #tpu.dot_dimension_numbers<[1], [0], [0], [1], [0, 0, 1, 1], [], []>} : vector<2x32xf32>, vector<32x128xf32>, vector<2x128xf32> -> vector<2x128xf32>
    %50 = arith.addf %48, %49 : vector<2x128xf32>
    %51 = arith.negf %50 : vector<2x128xf32>
    %52 = math.exp %51 : vector<2x128xf32>
    %cst_16 = arith.constant 1.000000e+00 : f32
    %53 = vector.broadcast %cst_16 : f32 to vector<2x128xf32>
    %54 = arith.addf %53, %52 : vector<2x128xf32>
    %55 = arith.divf %53, %54 : vector<2x128xf32>
    %56 = vector.extract_strided_slice %55 {offsets = [0, 0], sizes = [2, 32], strides = [1, 1]} : vector<2x128xf32> to vector<2x32xf32>
    %57 = vector.extract_strided_slice %55 {offsets = [0, 32], sizes = [2, 32], strides = [1, 1]} : vector<2x128xf32> to vector<2x32xf32>
    %58 = vector.extract_strided_slice %55 {offsets = [0, 96], sizes = [2, 32], strides = [1, 1]} : vector<2x128xf32> to vector<2x32xf32>
    %59 = vector.extract_strided_slice %50 {offsets = [0, 64], sizes = [2, 32], strides = [1, 1]} : vector<2x128xf32> to vector<2x32xf32>
    %60 = math.tanh %59 : vector<2x32xf32>
    %61 = arith.mulf %57, %45 : vector<2x32xf32>
    %62 = arith.mulf %56, %60 : vector<2x32xf32>
    %63 = arith.addf %61, %62 : vector<2x32xf32>
    %64 = math.tanh %63 : vector<2x32xf32>
    %65 = arith.mulf %58, %64 : vector<2x32xf32>
    %66 = vector.extract_strided_slice %9 {offsets = [6, 0], sizes = [2, 128], strides = [1, 1]} : vector<16x128xf32> to vector<2x128xf32>
    %cst_17 = arith.constant dense<0.000000e+00> : vector<2x128xf32>
    %67 = tpu.matmul %65, %3, %cst_17 {dimension_numbers = #tpu.dot_dimension_numbers<[1], [0], [0], [1], [0, 0, 1, 1], [], []>} : vector<2x32xf32>, vector<32x128xf32>, vector<2x128xf32> -> vector<2x128xf32>
    %68 = arith.addf %66, %67 : vector<2x128xf32>
    %69 = arith.negf %68 : vector<2x128xf32>
    %70 = math.exp %69 : vector<2x128xf32>
    %cst_18 = arith.constant 1.000000e+00 : f32
    %71 = vector.broadcast %cst_18 : f32 to vector<2x128xf32>
    %72 = arith.addf %71, %70 : vector<2x128xf32>
    %73 = arith.divf %71, %72 : vector<2x128xf32>
    %74 = vector.extract_strided_slice %73 {offsets = [0, 0], sizes = [2, 32], strides = [1, 1]} : vector<2x128xf32> to vector<2x32xf32>
    %75 = vector.extract_strided_slice %73 {offsets = [0, 32], sizes = [2, 32], strides = [1, 1]} : vector<2x128xf32> to vector<2x32xf32>
    %76 = vector.extract_strided_slice %73 {offsets = [0, 96], sizes = [2, 32], strides = [1, 1]} : vector<2x128xf32> to vector<2x32xf32>
    %77 = vector.extract_strided_slice %68 {offsets = [0, 64], sizes = [2, 32], strides = [1, 1]} : vector<2x128xf32> to vector<2x32xf32>
    %78 = math.tanh %77 : vector<2x32xf32>
    %79 = arith.mulf %75, %63 : vector<2x32xf32>
    %80 = arith.mulf %74, %78 : vector<2x32xf32>
    %81 = arith.addf %79, %80 : vector<2x32xf32>
    %82 = math.tanh %81 : vector<2x32xf32>
    %83 = arith.mulf %76, %82 : vector<2x32xf32>
    %84 = vector.extract_strided_slice %9 {offsets = [8, 0], sizes = [2, 128], strides = [1, 1]} : vector<16x128xf32> to vector<2x128xf32>
    %cst_19 = arith.constant dense<0.000000e+00> : vector<2x128xf32>
    %85 = tpu.matmul %83, %3, %cst_19 {dimension_numbers = #tpu.dot_dimension_numbers<[1], [0], [0], [1], [0, 0, 1, 1], [], []>} : vector<2x32xf32>, vector<32x128xf32>, vector<2x128xf32> -> vector<2x128xf32>
    %86 = arith.addf %84, %85 : vector<2x128xf32>
    %87 = arith.negf %86 : vector<2x128xf32>
    %88 = math.exp %87 : vector<2x128xf32>
    %cst_20 = arith.constant 1.000000e+00 : f32
    %89 = vector.broadcast %cst_20 : f32 to vector<2x128xf32>
    %90 = arith.addf %89, %88 : vector<2x128xf32>
    %91 = arith.divf %89, %90 : vector<2x128xf32>
    %92 = vector.extract_strided_slice %91 {offsets = [0, 0], sizes = [2, 32], strides = [1, 1]} : vector<2x128xf32> to vector<2x32xf32>
    %93 = vector.extract_strided_slice %91 {offsets = [0, 32], sizes = [2, 32], strides = [1, 1]} : vector<2x128xf32> to vector<2x32xf32>
    %94 = vector.extract_strided_slice %91 {offsets = [0, 96], sizes = [2, 32], strides = [1, 1]} : vector<2x128xf32> to vector<2x32xf32>
    %95 = vector.extract_strided_slice %86 {offsets = [0, 64], sizes = [2, 32], strides = [1, 1]} : vector<2x128xf32> to vector<2x32xf32>
    %96 = math.tanh %95 : vector<2x32xf32>
    %97 = arith.mulf %93, %81 : vector<2x32xf32>
    %98 = arith.mulf %92, %96 : vector<2x32xf32>
    %99 = arith.addf %97, %98 : vector<2x32xf32>
    %100 = math.tanh %99 : vector<2x32xf32>
    %101 = arith.mulf %94, %100 : vector<2x32xf32>
    %102 = vector.extract_strided_slice %9 {offsets = [10, 0], sizes = [2, 128], strides = [1, 1]} : vector<16x128xf32> to vector<2x128xf32>
    %cst_21 = arith.constant dense<0.000000e+00> : vector<2x128xf32>
    %103 = tpu.matmul %101, %3, %cst_21 {dimension_numbers = #tpu.dot_dimension_numbers<[1], [0], [0], [1], [0, 0, 1, 1], [], []>} : vector<2x32xf32>, vector<32x128xf32>, vector<2x128xf32> -> vector<2x128xf32>
    %104 = arith.addf %102, %103 : vector<2x128xf32>
    %105 = arith.negf %104 : vector<2x128xf32>
    %106 = math.exp %105 : vector<2x128xf32>
    %cst_22 = arith.constant 1.000000e+00 : f32
    %107 = vector.broadcast %cst_22 : f32 to vector<2x128xf32>
    %108 = arith.addf %107, %106 : vector<2x128xf32>
    %109 = arith.divf %107, %108 : vector<2x128xf32>
    %110 = vector.extract_strided_slice %109 {offsets = [0, 0], sizes = [2, 32], strides = [1, 1]} : vector<2x128xf32> to vector<2x32xf32>
    %111 = vector.extract_strided_slice %109 {offsets = [0, 32], sizes = [2, 32], strides = [1, 1]} : vector<2x128xf32> to vector<2x32xf32>
    %112 = vector.extract_strided_slice %109 {offsets = [0, 96], sizes = [2, 32], strides = [1, 1]} : vector<2x128xf32> to vector<2x32xf32>
    %113 = vector.extract_strided_slice %104 {offsets = [0, 64], sizes = [2, 32], strides = [1, 1]} : vector<2x128xf32> to vector<2x32xf32>
    %114 = math.tanh %113 : vector<2x32xf32>
    %115 = arith.mulf %111, %99 : vector<2x32xf32>
    %116 = arith.mulf %110, %114 : vector<2x32xf32>
    %117 = arith.addf %115, %116 : vector<2x32xf32>
    %118 = math.tanh %117 : vector<2x32xf32>
    %119 = arith.mulf %112, %118 : vector<2x32xf32>
    %120 = vector.extract_strided_slice %9 {offsets = [12, 0], sizes = [2, 128], strides = [1, 1]} : vector<16x128xf32> to vector<2x128xf32>
    %cst_23 = arith.constant dense<0.000000e+00> : vector<2x128xf32>
    %121 = tpu.matmul %119, %3, %cst_23 {dimension_numbers = #tpu.dot_dimension_numbers<[1], [0], [0], [1], [0, 0, 1, 1], [], []>} : vector<2x32xf32>, vector<32x128xf32>, vector<2x128xf32> -> vector<2x128xf32>
    %122 = arith.addf %120, %121 : vector<2x128xf32>
    %123 = arith.negf %122 : vector<2x128xf32>
    %124 = math.exp %123 : vector<2x128xf32>
    %cst_24 = arith.constant 1.000000e+00 : f32
    %125 = vector.broadcast %cst_24 : f32 to vector<2x128xf32>
    %126 = arith.addf %125, %124 : vector<2x128xf32>
    %127 = arith.divf %125, %126 : vector<2x128xf32>
    %128 = vector.extract_strided_slice %127 {offsets = [0, 0], sizes = [2, 32], strides = [1, 1]} : vector<2x128xf32> to vector<2x32xf32>
    %129 = vector.extract_strided_slice %127 {offsets = [0, 32], sizes = [2, 32], strides = [1, 1]} : vector<2x128xf32> to vector<2x32xf32>
    %130 = vector.extract_strided_slice %127 {offsets = [0, 96], sizes = [2, 32], strides = [1, 1]} : vector<2x128xf32> to vector<2x32xf32>
    %131 = vector.extract_strided_slice %122 {offsets = [0, 64], sizes = [2, 32], strides = [1, 1]} : vector<2x128xf32> to vector<2x32xf32>
    %132 = math.tanh %131 : vector<2x32xf32>
    %133 = arith.mulf %129, %117 : vector<2x32xf32>
    %134 = arith.mulf %128, %132 : vector<2x32xf32>
    %135 = arith.addf %133, %134 : vector<2x32xf32>
    %136 = math.tanh %135 : vector<2x32xf32>
    %137 = arith.mulf %130, %136 : vector<2x32xf32>
    %138 = vector.extract_strided_slice %9 {offsets = [14, 0], sizes = [2, 128], strides = [1, 1]} : vector<16x128xf32> to vector<2x128xf32>
    %cst_25 = arith.constant dense<0.000000e+00> : vector<2x128xf32>
    %139 = tpu.matmul %137, %3, %cst_25 {dimension_numbers = #tpu.dot_dimension_numbers<[1], [0], [0], [1], [0, 0, 1, 1], [], []>} : vector<2x32xf32>, vector<32x128xf32>, vector<2x128xf32> -> vector<2x128xf32>
    %140 = arith.addf %138, %139 : vector<2x128xf32>
    %141 = arith.negf %140 : vector<2x128xf32>
    %142 = math.exp %141 : vector<2x128xf32>
    %cst_26 = arith.constant 1.000000e+00 : f32
    %143 = vector.broadcast %cst_26 : f32 to vector<2x128xf32>
    %144 = arith.addf %143, %142 : vector<2x128xf32>
    %145 = arith.divf %143, %144 : vector<2x128xf32>
    %146 = vector.extract_strided_slice %145 {offsets = [0, 0], sizes = [2, 32], strides = [1, 1]} : vector<2x128xf32> to vector<2x32xf32>
    %147 = vector.extract_strided_slice %145 {offsets = [0, 32], sizes = [2, 32], strides = [1, 1]} : vector<2x128xf32> to vector<2x32xf32>
    %148 = vector.extract_strided_slice %145 {offsets = [0, 96], sizes = [2, 32], strides = [1, 1]} : vector<2x128xf32> to vector<2x32xf32>
    %149 = vector.extract_strided_slice %140 {offsets = [0, 64], sizes = [2, 32], strides = [1, 1]} : vector<2x128xf32> to vector<2x32xf32>
    %150 = math.tanh %149 : vector<2x32xf32>
    %151 = arith.mulf %147, %135 : vector<2x32xf32>
    %152 = arith.mulf %146, %150 : vector<2x32xf32>
    %153 = arith.addf %151, %152 : vector<2x32xf32>
    %154 = math.tanh %153 : vector<2x32xf32>
    %155 = arith.mulf %148, %154 : vector<2x32xf32>
    %156 = tpu.concatenate %29, %47, %65, %83, %101, %119, %137, %155 in 1 : vector<2x32xf32>, vector<2x32xf32>, vector<2x32xf32>, vector<2x32xf32>, vector<2x32xf32>, vector<2x32xf32>, vector<2x32xf32>, vector<2x32xf32> -> vector<2x256xf32>
    %c0_27 = arith.constant 0 : index
    %c0_28 = arith.constant 0 : index
    %157 = vector.load %arg7[%c0_27, %c0_28] : memref<2x256xf32, #tpu.memory_space<vmem>>, vector<2x256xf32>
    tpu.vector_store %arg7[%c0_27, %c0_28], %156 {strides = array<i32>} : memref<2x256xf32, #tpu.memory_space<vmem>>, vector<2x256xf32>,
    %c0_29 = arith.constant 0 : index
    %c0_30 = arith.constant 0 : index
    %158 = vector.load %arg8[%c0_29, %c0_30] : memref<2x32xf32, #tpu.memory_space<vmem>>, vector<2x32xf32>
    tpu.vector_store %arg8[%c0_29, %c0_30], %153 {strides = array<i32>} : memref<2x32xf32, #tpu.memory_space<vmem>>, vector<2x32xf32>,
    return
  }
  func.func @transform_0(%arg0: i32) -> (i32, i32) {
    %c0_i32 = arith.constant 0 : i32
    %c0_i32_0 = arith.constant 0 : i32
    %c0_i32_1 = arith.constant 0 : i32
    return %c0_i32, %c0_i32_0 : i32, i32
  }
  func.func @transform_1(%arg0: i32) -> (i32, i32) {
    %c0_i32 = arith.constant 0 : i32
    %c0_i32_0 = arith.constant 0 : i32
    %c0_i32_1 = arith.constant 0 : i32
    return %c0_i32, %c0_i32_0 : i32, i32
  }
  func.func @transform_2(%arg0: i32) -> (i32, i32) {
    %c0_i32 = arith.constant 0 : i32
    %c0_i32_0 = arith.constant 0 : i32
    %c0_i32_1 = arith.constant 0 : i32
    return %c0_i32, %c0_i32_0 : i32, i32
  }
  func.func @transform_3(%arg0: i32) -> (i32, i32) {
    %c0_i32 = arith.constant 0 : i32
    %c0_i32_0 = arith.constant 0 : i32
    %c0_i32_1 = arith.constant 0 : i32
    return %c0_i32, %c0_i32_0 : i32, i32
  }
  func.func @transform_4(%arg0: i32) -> (i32, i32) {
    %c0_i32 = arith.constant 0 : i32
    %c0_i32_0 = arith.constant 0 : i32
    %c0_i32_1 = arith.constant 0 : i32
    return %c0_i32, %c0_i32_0 : i32, i32
  }
  func.func @transform_5(%arg0: i32) -> (i32, i32) {
    %c0_i32 = arith.constant 0 : i32
    %c0_i32_0 = arith.constant 0 : i32
    %c0_i32_1 = arith.constant 0 : i32
    return %c0_i32, %c0_i32_0 : i32, i32
  }
  func.func @transform_6(%arg0: i32) -> (i32, i32) {
    %c0_i32 = arith.constant 0 : i32
    %c0_i32_0 = arith.constant 0 : i32
    %c0_i32_1 = arith.constant 0 : i32
    return %c0_i32, %c0_i32_0 : i32, i32
  }
  func.func @transform_7(%arg0: i32) -> (i32, i32) {
    %c0_i32 = arith.constant 0 : i32
    %c0_i32_0 = arith.constant 0 : i32
    %c0_i32_1 = arith.constant 0 : i32
    return %c0_i32, %c0_i32_0 : i32, i32
  }
}

</mosaic_0001>

<bundles_post_ra>
// kernel: rnn_forward.1
= control target key start
LH: loop header
LB: loop body
LE: loop exit
PB: predicated region body
PF: predicated region fallthrough
CT: control target
= control target key end

     0   :  { %v1383_v3 = vmov 0.0|0.0   ;;  %vm53_vm0 = vcmask 261120   ;;  %s1608_s0 = inlined_call_operand.vmem [shape: bf16[16,32], index: 0, kind: input, shape index: {}]   ;;  %s1609_s1 = inlined_call_operand.vmem [shape: f32[2,32], index: 1, kind: input, shape index: {}]   ;;  %s1610_s2 = inlined_call_operand.vmem [shape: f32[2,32], index: 2, kind: input, shape index: {}]   ;;  %s1611_s3 = inlined_call_operand.vmem [shape: bf16[32,128], index: 3, kind: input, shape index: {}]   ;;  %s1612_s4 = inlined_call_operand.vmem [shape: bf16[32,128], index: 4, kind: input, shape index: {}]   ;;  %s1613_s5 = inlined_call_operand.vmem [shape: f32[1,128], index: 5, kind: input, shape index: {}]   ;;  %s1614_s6 = inlined_call_operand.vmem [shape: f32[2,256], index: 6, kind: output, shape index: {0}]   ;;  %s1615_s7 = inlined_call_operand.hbm [shape: f32[2,32], index: 7, kind: output, shape index: {1}]  }
   0x1   :  { %v1066_v0 = vld [vmem:[%s1611_s3] sm:$0xff]   ;;  %v1085_v2 = vld [vmem:[%s1611_s3 + $0x8] sm:$0xff]   ;;  %1240 = vmatprep.subr.bf16.mxu1 %v1383_v3 }
   0x2   :  { %v1436_v1 = vld [vmem:[%s1612_s4] sm:$0xff]   ;;  %1233 = vmatprep.subr.bf16.mxu0 %v1066_v0 }
   0x3   :  { %v1082_v4 = vld [vmem:[%s1608_s0] sm:$0xff]   ;;  %1235 = vmatpush3.bf16.msra.mxu0 %v1066_v0  ;;  %1242 = vmatpush3.bf16.msra.mxu1 %v1436_v1 }
   0x4   :  { %v1083_v5 = vunpack.c.l.bf16 %v1082_v4 }
   0x5   :  { %13 = vsyncpa [#allocation3], 0  ;;  %1237 = vmatprep.subr.bf16.mxu0 %v1085_v2  ;;  %1243 = vmatprep.subr.bf16.mxu1 %v1383_v3  ;;  %v1450_v6 = vld [vmem:[%s1612_s4 + $0x8] sm:$0xff]   ;;  %vm1384_vm1 = vmmov 0   ;;  %v1385_v7 = vmov 0.0   ;;  %v1084_v8 = vunpack.c.h.bf16 %v1082_v4  ;;  %s1386_s11 = smov 64  }
   0x6   :  { %1141 = vmatprep.mubr.msk.f32.mxu0 %vm53_vm0, %v1083_v5  ;;  %1152 = vmatprep.mubr.msk.f32.mxu1 %vm1384_vm1, %v1385_v7  ;;  %v135_v9 = vld [vmem:[%s1609_s1] sm:$0x3]  ;;  %s1389_s14 = smov [#allocation2]   ;;  %vm1025_vm2 = vcmask 261126  }
   0x7   :  { %1239 = vmatpush3.bf16.msra.mxu0 %v1085_v2  ;;  %1245 = vmatpush3.bf16.msra.mxu1 %v1450_v6  ;;  %v1045_v10 = vld [vmem:[%s1613_s5] ss:$0 sm:$0xff]  ;;  %s1387_s5 = smov 32   ;;  %s1035_s15 = sshll.u32 %s1389_s14, 4  ;;  %s1036_s15 = int_to_ptr.vmem [resolvable:$true] %s1035_s15 }
   0x8   :  { %1246 = vmatprep.subr.bf16.mxu0 %v1383_v3  ;;  %1252 = vmatprep.subr.bf16.mxu1 %v1383_v3  ;;  %v136_v19 = vld [vmem:[%s1610_s2] sm:$0x3]  ;;  %s1388_s2 = smov 96   ;;  %s1359_s16 = scalar_lea.vmem %s1036_s15, 32 }
   0x9   :  { %p1360_p0 = scmp.ne.s32.totalorder %s1036_s15, %s1359_s16  ;;  %p1364_p1 = scmp.lt.s32.totalorder %s1036_s15, %s1036_s15 }
   0xa   :  { %1142 = vmatmul.mubr.msk.f32.vlgmr.msra.gmra.mrb[0].mxu0 %vm53_vm0, %v1084_v8  ;;  %1153 = vmatmul.mubr.msk.f32.vlgmr.msra.gmra.mrb[0].mxu1 %vm53_vm0, %v135_v9  ;;  %p1365_p2 = scmp.lt.s32.totalorder %s1359_s16, %s1359_s16 }
   0xb   :  { %1248 = vmatpush3.bf16.msra.mxu0 %v1436_v1  ;;  %1163 = vmatprep.mubr.msk.f32.mxu0 %vm1384_vm1, %v1385_v7 }
   0xc   :  { %1249 = vmatprep.subr.bf16.mxu0 %v1383_v3  ;;  %1254 = vmatpush3.bf16.msra.mxu1 %v1436_v1  ;;  %p1366_p3 = por %p1365_p2, %p1364_p1 }
   0xd   :  { %1255 = vmatprep.subr.bf16.mxu1 %v1383_v3  ;;  %1174 = vmatprep.mubr.msk.f32.mxu1 %vm1384_vm1, %v1385_v7 }
   0xe   :  { %p1367_p4 = pnand %p1366_p3, %p1360_p0 }
   0xf   :  { %1251 = vmatpush3.bf16.msra.mxu0 %v1450_v6 }
  0x10   :  { %1257 = vmatpush3.bf16.msra.mxu1 %v1450_v6  ;;  %1258 = vmatprep.subr.bf16.mxu0 %v1383_v3 }
  0x11   :  { %1264 = vmatprep.subr.bf16.mxu1 %v1383_v3 }
  0xdd   :  { %v1143_v11 = vpop.f32.mrb[0].mxu0  ;;  %v206_v12 = vpop.f32.mrb[0].mxu1 }
  0xde   :  { %v1478_v13 = vadd.f32 %v1143_v11, %v1045_v10  ;;  %v126_v14 = vpop.f32.mrb[1].mxu0  ;;  %v1154_v15 = vpop.f32.mrb[1].mxu1 }
  0xdf   :  { %v1480_v16 = vadd.f32 %v1045_v10, %v126_v14 }
  0xe1   :  { %v210_v17 = vadd.f32 %v206_v12, %v1480_v16 }
  0xe3   :  { %1295 = vtanh.f32 %v210_v17  ;;  %v1049_v20 = vmul.f32 -1.442695, %v210_v17 }
  0xe5   :  { %1297 = vpow2.f32 %v1049_v20 }
  0xed   :  { %v1296_v18 = vpop.eup %1295 }
  0xee   :  { %224 = vrot.lane.b32.xlu0 %v1296_v18, %s1386_s11 }
  0xef   :  { %v1298_v21 = vpop.eup %1297 }
  0xf0   :  { %v214_v22 = vadd.f32 1.0, %v1298_v21 }
  0xf2   :  { %219 = vrot.lane.b32.xlu0 %v136_v19, %s1387_s5  ;;  %1299 = vrcp.f32 %v214_v22 }
  0xfc   :  { %v1300_v23 = vpop.eup %1299 }
 0x160   :  { %v225_v24 = vpop.permute.xlu0 %224 }
 0x161   :  { %v227_v25 = vmul.f32 %v1300_v23, %v225_v24 }
 0x163   :  { %229 = vrot.lane.b32.xlu1 %v227_v25, %s1387_s5 }
 0x164   :  { %v220_v26 = vpop.permute.xlu0 %219 }
 0x165   :  { %v222_v27 = vmul.f32 %v1300_v23, %v220_v26 }
 0x1d5   :  { %v230_v28 = vpop.permute.xlu1 %229 }
 0x1d6   :  { %v232_v29 = vadd.f32 %v230_v28, %v222_v27 }
 0x1d8   :  { %1301 = vtanh.f32 %v232_v29  ;;  %v326_v45 = vrot.slane %v232_v29, 6 }
 0x1e2   :  { %v1302_v30 = vpop.eup %1301 }
 0x1e3   :  { %235 = vrot.lane.b32.xlu1 %v1302_v30, %s1386_s11 }
 0x255   :  { %v236_v31 = vpop.permute.xlu1 %235 }
 0x256   :  { %v238_v32 = vmul.f32 %v1300_v23, %v236_v31 }
 0x258   :  { %240 = vrot.lane.b32.xlu0 %v238_v32, %s1387_s5 }
 0x2ca   :  { %v1491_v33 = vpop.permute.xlu0 %240 }
 0x2cb   :  { %1164 = vmatmul.mubr.msk.f32.vlgmr.msra.gmra.mrb[2].mxu0 %vm53_vm0, %v1491_v33 }
 0x2cc   :  { %1260 = vmatpush3.bf16.msra.mxu0 %v1436_v1  ;;  %1185 = vmatprep.mubr.msk.f32.mxu0 %vm1384_vm1, %v1385_v7 }
 0x2cd   :  { %1261 = vmatprep.subr.bf16.mxu0 %v1383_v3 }
 0x2d0   :  { %1263 = vmatpush3.bf16.msra.mxu0 %v1450_v6 }
 0x2d1   :  { %1270 = vmatprep.subr.bf16.mxu0 %v1383_v3 }
 0x39e   :  { %v310_v34 = vpop.f32.mrb[2].mxu0 }
 0x39f   :  { %v315_v35 = vrot.slane %v310_v34, 6  ;;  %v1165_v36 = vpop.f32.mrb[3].mxu0 }
 0x3a1   :  { %v317_v37 = vadd.f32 %v315_v35, %v1480_v16 }
 0x3a3   :  { %1303 = vtanh.f32 %v317_v37  ;;  %v1051_v39 = vmul.f32 -1.442695, %v317_v37 }
 0x3a5   :  { %1305 = vpow2.f32 %v1051_v39 }
 0x3ad   :  { %v1304_v38 = vpop.eup %1303 }
 0x3ae   :  { %330 = vrot.lane.b32.xlu1 %v1304_v38, %s1386_s11 }
 0x3af   :  { %v1306_v40 = vpop.eup %1305 }
 0x3b0   :  { %v321_v41 = vadd.f32 1.0, %v1306_v40 }
 0x3b2   :  { %1307 = vrcp.f32 %v321_v41 }
 0x3bc   :  { %v1308_v42 = vpop.eup %1307 }
 0x3bd   :  { %v328_v46 = vmul.f32 %v1308_v42, %v326_v45 }
 0x420   :  { %v331_v43 = vpop.permute.xlu1 %330 }
 0x421   :  { %v333_v44 = vmul.f32 %v1308_v42, %v331_v43 }
 0x423   :  { %335 = vrot.lane.b32.xlu0 %v333_v44, %s1387_s5 }
 0x495   :  { %v336_v47 = vpop.permute.xlu0 %335 }
 0x496   :  { %v338_v48 = vadd.f32 %v336_v47, %v328_v46 }
 0x498   :  { %1309 = vtanh.f32 %v338_v48  ;;  %v433_v2 = vrot.slane %v338_v48, 6 }
 0x4a2   :  { %v1310_v49 = vpop.eup %1309 }
 0x4a3   :  { %341 = vrot.lane.b32.xlu1 %v1310_v49, %s1386_s11 }
 0x515   :  { %v342_v50 = vpop.permute.xlu1 %341 }
 0x516   :  { %v1505_v51 = vmul.f32 %v1308_v42, %v342_v50 }
 0x518   :  { %v346_v52 = vrot.slane %v1505_v51, 2 }
 0x51a   :  { %347 = vrot.lane.b32.xlu0 %v346_v52, %s1387_s5 }
 0x58c   :  { %v348_v53 = vpop.permute.xlu0 %347 }
 0x58d   :  { %1175 = vmatmul.mubr.msk.f32.vlgmr.msra.gmra.mrb[2].mxu1 %vm53_vm0, %v348_v53 }
 0x58e   :  { %1266 = vmatpush3.bf16.msra.mxu1 %v1436_v1  ;;  %1196 = vmatprep.mubr.msk.f32.mxu1 %vm1384_vm1, %v1385_v7 }
 0x58f   :  { %1267 = vmatprep.subr.bf16.mxu1 %v1383_v3 }
 0x592   :  { %1269 = vmatpush3.bf16.msra.mxu1 %v1450_v6 }
 0x593   :  { %1276 = vmatprep.subr.bf16.mxu1 %v1383_v3 }
 0x660   :  { %v417_v54 = vpop.f32.mrb[2].mxu1 }
 0x661   :  { %v422_v55 = vrot.slane %v417_v54, 4  ;;  %v1176_v56 = vpop.f32.mrb[3].mxu1 }
 0x663   :  { %v424_v57 = vadd.f32 %v422_v55, %v1480_v16 }
 0x665   :  { %1311 = vtanh.f32 %v424_v57  ;;  %v1053_v59 = vmul.f32 -1.442695, %v424_v57 }
 0x667   :  { %1313 = vpow2.f32 %v1053_v59 }
 0x66f   :  { %v1312_v58 = vpop.eup %1311 }
 0x670   :  { %437 = vrot.lane.b32.xlu1 %v1312_v58, %s1386_s11 }
 0x671   :  { %v1314_v60 = vpop.eup %1313 }
 0x672   :  { %v428_v61 = vadd.f32 1.0, %v1314_v60 }
 0x674   :  { %1315 = vrcp.f32 %v428_v61 }
 0x67e   :  { %v1316_v62 = vpop.eup %1315 }
 0x67f   :  { %v435_v4 = vmul.f32 %v1316_v62, %v433_v2 }
 0x6e2   :  { %v438_v63 = vpop.permute.xlu1 %437 }
 0x6e3   :  { %v440_v0 = vmul.f32 %v1316_v62, %v438_v63 }
 0x6e5   :  { %442 = vrot.lane.b32.xlu0 %v440_v0, %s1387_s5 }
 0x757   :  { %v443_v5 = vpop.permute.xlu0 %442 }
 0x758   :  { %v445_v8 = vadd.f32 %v443_v5, %v435_v4 }
 0x75a   :  { %1317 = vtanh.f32 %v445_v8  ;;  %v540_v27 = vrot.slane %v445_v8, 6 }
 0x764   :  { %v1318_v9 = vpop.eup %1317 }
 0x765   :  { %448 = vrot.lane.b32.xlu1 %v1318_v9, %s1386_s11 }
 0x7d7   :  { %v449_v10 = vpop.permute.xlu1 %448 }
 0x7d8   :  { %v1522_v11 = vmul.f32 %v1316_v62, %v449_v10 }
 0x7da   :  { %v453_v12 = vrot.slane %v1522_v11, 4 }
 0x7dc   :  { %454 = vrot.lane.b32.xlu0 %v453_v12, %s1387_s5 }
 0x84e   :  { %v455_v14 = vpop.permute.xlu0 %454 }
 0x84f   :  { %1186 = vmatmul.mubr.msk.f32.vlgmr.msra.gmra.mrb[4].mxu0 %vm53_vm0, %v455_v14 }
 0x850   :  { %1272 = vmatpush3.bf16.msra.mxu0 %v1436_v1  ;;  %1207 = vmatprep.mubr.msk.f32.mxu0 %vm1384_vm1, %v1385_v7 }
 0x851   :  { %1273 = vmatprep.subr.bf16.mxu0 %v1383_v3 }
 0x854   :  { %1275 = vmatpush3.bf16.msra.mxu0 %v1450_v6 }
 0x855   :  { %1282 = vmatprep.subr.bf16.mxu0 %v1383_v3 }
 0x922   :  { %v524_v15 = vpop.f32.mrb[4].mxu0 }
 0x923   :  { %v529_v17 = vrot.slane %v524_v15, 2  ;;  %v1187_v18 = vpop.f32.mrb[5].mxu0 }
 0x925   :  { %v531_v19 = vadd.f32 %v529_v17, %v1480_v16 }
 0x927   :  { %1319 = vtanh.f32 %v531_v19  ;;  %v1055_v21 = vmul.f32 -1.442695, %v531_v19 }
 0x929   :  { %1321 = vpow2.f32 %v1055_v21 }
 0x931   :  { %v1320_v20 = vpop.eup %1319 }
 0x932   :  { %544 = vrot.lane.b32.xlu1 %v1320_v20, %s1386_s11 }
 0x933   :  { %v1322_v22 = vpop.eup %1321 }
 0x934   :  { %v535_v23 = vadd.f32 1.0, %v1322_v22 }
 0x936   :  { %1323 = vrcp.f32 %v535_v23 }
 0x940   :  { %v1324_v24 = vpop.eup %1323 }
 0x941   :  { %v542_v28 = vmul.f32 %v1324_v24, %v540_v27 }
 0x9a4   :  { %v545_v25 = vpop.permute.xlu1 %544 }
 0x9a5   :  { %v547_v26 = vmul.f32 %v1324_v24, %v545_v25 }
 0x9a7   :  { %549 = vrot.lane.b32.xlu0 %v547_v26, %s1387_s5 }
 0xa19   :  { %v550_v29 = vpop.permute.xlu0 %549 }
 0xa1a   :  { %v552_v30 = vadd.f32 %v550_v29, %v542_v28 }
 0xa1c   :  { %1325 = vtanh.f32 %v552_v30  ;;  %v644_v46 = vrot.slane %v552_v30, 6 }
 0xa26   :  { %v1326_v16 = vpop.eup %1325 }
 0xa27   :  { %555 = vrot.lane.b32.xlu1 %v1326_v16, %s1386_s11 }
 0xa99   :  { %v556_v31 = vpop.permute.xlu1 %555 }
 0xa9a   :  { %v1539_v32 = vmul.f32 %v1324_v24, %v556_v31 }
 0xa9c   :  { %v560_v34 = vrot.slane %v1539_v32, 6 }
 0xa9e   :  { %561 = vrot.lane.b32.xlu0 %v560_v34, %s1387_s5 }
 0xb10   :  { %v562_v35 = vpop.permute.xlu0 %561 }
 0xb11   :  { %1197 = vmatmul.mubr.msk.f32.vlgmr.msra.gmra.mrb[4].mxu1 %vm53_vm0, %v562_v35 }
 0xb12   :  { %1278 = vmatpush3.bf16.msra.mxu1 %v1436_v1  ;;  %1218 = vmatprep.mubr.msk.f32.mxu1 %vm1384_vm1, %v1385_v7 }
 0xb13   :  { %1279 = vmatprep.subr.bf16.mxu1 %v1383_v3 }
 0xb16   :  { %1281 = vmatpush3.bf16.msra.mxu1 %v1450_v6 }
 0xbe4   :  { %v631_v36 = vpop.f32.mrb[4].mxu1 }
 0xbe5   :  { %v635_v37 = vadd.f32 %v631_v36, %v1478_v13  ;;  %v1198_v38 = vpop.f32.mrb[5].mxu1 }
 0xbe7   :  { %1327 = vtanh.f32 %v635_v37  ;;  %v1057_v40 = vmul.f32 -1.442695, %v635_v37 }
 0xbe9   :  { %1329 = vpow2.f32 %v1057_v40 }
 0xbf1   :  { %v1328_v39 = vpop.eup %1327 }
 0xbf2   :  { %648 = vrot.lane.b32.xlu1 %v1328_v39, %s1386_s11 }
 0xbf3   :  { %v1330_v41 = vpop.eup %1329 }
 0xbf4   :  { %v639_v42 = vadd.f32 1.0, %v1330_v41 }
 0xbf6   :  { %1331 = vrcp.f32 %v639_v42 }
 0xc00   :  { %v1332_v43 = vpop.eup %1331 }
 0xc01   :  { %v646_v47 = vmul.f32 %v1332_v43, %v644_v46 }
 0xc64   :  { %v649_v44 = vpop.permute.xlu1 %648 }
 0xc65   :  { %v651_v45 = vmul.f32 %v1332_v43, %v649_v44 }
 0xc67   :  { %653 = vrot.lane.b32.xlu0 %v651_v45, %s1387_s5 }
 0xcd9   :  { %v654_v48 = vpop.permute.xlu0 %653 }
 0xcda   :  { %v656_v49 = vadd.f32 %v654_v48, %v646_v47 }
 0xcdc   :  { %1333 = vtanh.f32 %v656_v49 }
 0xce6   :  { %v1334_v50 = vpop.eup %1333 }
 0xce7   :  { %659 = vrot.lane.b32.xlu1 %v1334_v50, %s1386_s11 }
 0xd59   :  { %v660_v53 = vpop.permute.xlu1 %659 }
 0xd5a   :  { %v662_v54 = vmul.f32 %v1332_v43, %v660_v53 }
 0xd5c   :  { %664 = vrot.lane.b32.xlu0 %v662_v54, %s1387_s5 }
 0xdce   :  { %v1556_v55 = vpop.permute.xlu0 %664 }
 0xdcf   :  { %1208 = vmatmul.mubr.msk.f32.vlgmr.msra.gmra.mrb[6].mxu0 %vm53_vm0, %v1556_v55 }
 0xdd0   :  { %1284 = vmatpush3.bf16.msra.mxu0 %v1436_v1  ;;  %1229 = vmatprep.mubr.msk.f32.mxu0 %vm1384_vm1, %v1385_v7 }
 0xdd1   :  { %1285 = vmatprep.subr.bf16.mxu0 %v1383_v3  ;;  %v750_v3 = vrot.slane %v656_v49, 6 }
 0xdd4   :  { %1287 = vmatpush3.bf16.msra.mxu0 %v1450_v6 }
 0xea2   :  { %v734_v56 = vpop.f32.mrb[6].mxu0 }
 0xea3   :  { %v739_v57 = vrot.slane %v734_v56, 6  ;;  %v1209_v58 = vpop.f32.mrb[7].mxu0 }
 0xea5   :  { %v741_v59 = vadd.f32 %v739_v57, %v1478_v13 }
 0xea7   :  { %1335 = vtanh.f32 %v741_v59  ;;  %v1059_v61 = vmul.f32 -1.442695, %v741_v59 }
 0xea9   :  { %1337 = vpow2.f32 %v1059_v61 }
 0xeb1   :  { %v1336_v60 = vpop.eup %1335 }
 0xeb2   :  { %754 = vrot.lane.b32.xlu1 %v1336_v60, %s1386_s11 }
 0xeb3   :  { %v1338_v62 = vpop.eup %1337 }
 0xeb4   :  { %v745_v1 = vadd.f32 1.0, %v1338_v62 }
 0xeb6   :  { %1339 = vrcp.f32 %v745_v1 }
 0xec0   :  { %v1340_v63 = vpop.eup %1339 }
 0xec1   :  { %v752_v6 = vmul.f32 %v1340_v63, %v750_v3 }
 0xf24   :  { %v755_v7 = vpop.permute.xlu1 %754 }
 0xf25   :  { %v757_v0 = vmul.f32 %v1340_v63, %v755_v7 }
 0xf27   :  { %759 = vrot.lane.b32.xlu0 %v757_v0, %s1387_s5 }
 0xf99   :  { %v760_v2 = vpop.permute.xlu0 %759 }
 0xf9a   :  { %v762_v4 = vadd.f32 %v760_v2, %v752_v6 }
 0xf9c   :  { %1341 = vtanh.f32 %v762_v4  ;;  %v857_v27 = vrot.slane %v762_v4, 6 }
 0xfa6   :  { %v1342_v5 = vpop.eup %1341 }
 0xfa7   :  { %765 = vrot.lane.b32.xlu1 %v1342_v5, %s1386_s11 }
0x1019   :  { %v766_v8 = vpop.permute.xlu1 %765 }
0x101a   :  { %v768_v9 = vmul.f32 %v1340_v63, %v766_v8 }
0x101c   :  { %v770_v10 = vrot.slane %v768_v9, 2 }
0x101e   :  { %771 = vrot.lane.b32.xlu0 %v770_v10, %s1387_s5 }
0x1090   :  { %v772_v14 = vpop.permute.xlu0 %771 }
0x1091   :  { %1219 = vmatmul.mubr.msk.f32.vlgmr.msra.gmra.mrb[6].mxu1 %vm53_vm0, %v772_v14 }
0x1164   :  { %v841_v15 = vpop.f32.mrb[6].mxu1 }
0x1165   :  { %v846_v17 = vrot.slane %v841_v15, 4  ;;  %v1220_v18 = vpop.f32.mrb[7].mxu1 }
0x1167   :  { %v848_v19 = vadd.f32 %v846_v17, %v1478_v13 }
0x1169   :  { %1343 = vtanh.f32 %v848_v19  ;;  %v1061_v21 = vmul.f32 -1.442695, %v848_v19 }
0x116b   :  { %1345 = vpow2.f32 %v1061_v21 }
0x1173   :  { %v1344_v20 = vpop.eup %1343 }
0x1174   :  { %861 = vrot.lane.b32.xlu1 %v1344_v20, %s1386_s11 }
0x1175   :  { %v1346_v22 = vpop.eup %1345 }
0x1176   :  { %v852_v23 = vadd.f32 1.0, %v1346_v22 }
0x1178   :  { %1347 = vrcp.f32 %v852_v23 }
0x1182   :  { %v1348_v24 = vpop.eup %1347 }
0x1183   :  { %v859_v28 = vmul.f32 %v1348_v24, %v857_v27 }
0x11e6   :  { %v862_v25 = vpop.permute.xlu1 %861 }
0x11e7   :  { %v864_v26 = vmul.f32 %v1348_v24, %v862_v25 }
0x11e9   :  { %866 = vrot.lane.b32.xlu0 %v864_v26, %s1387_s5 }
0x125b   :  { %v867_v29 = vpop.permute.xlu0 %866 }
0x125c   :  { %v869_v30 = vadd.f32 %v867_v29, %v859_v28 }
0x125e   :  { %1349 = vtanh.f32 %v869_v30 }
0x1268   :  { %v1350_v16 = vpop.eup %1349 }
0x1269   :  { %872 = vrot.lane.b32.xlu1 %v1350_v16, %s1386_s11 }
0x12db   :  { %v873_v31 = vpop.permute.xlu1 %872 }
0x12dc   :  { %v875_v35 = vmul.f32 %v1348_v24, %v873_v31 }
0x12de   :  { %v877_v36 = vrot.slane %v875_v35, 4 }
0x12e0   :  { %878 = vrot.lane.b32.xlu0 %v877_v36, %s1387_s5 }
0x1352   :  { %v879_v37 = vpop.permute.xlu0 %878 }
0x1353   :  { %1230 = vmatmul.mubr.msk.f32.vlgmr.msra.gmra.mrb[8].mxu0 %vm53_vm0, %v879_v37 }
0x1426   :  { %v948_v38 = vpop.f32.mrb[8].mxu0 }
0x1427   :  { %v953_v39 = vrot.slane %v948_v38, 2  ;;  %v1231_v40 = vpop.f32.mrb[9].mxu0 }
0x1429   :  { %v955_v41 = vadd.f32 %v953_v39, %v1478_v13  ;;  %v964_v13 = vrot.slane %v869_v30, 6 }
0x142b   :  { %1351 = vtanh.f32 %v955_v41  ;;  %v1063_v43 = vmul.f32 -1.442695, %v955_v41 }
0x142d   :  { %1353 = vpow2.f32 %v1063_v43 }
0x1435   :  { %v1352_v42 = vpop.eup %1351 }
0x1436   :  { %968 = vrot.lane.b32.xlu1 %v1352_v42, %s1386_s11 }
0x1437   :  { %v1354_v44 = vpop.eup %1353 }
0x1438   :  { %v959_v45 = vadd.f32 1.0, %v1354_v44 }
0x143a   :  { %992 = vrot.lane.b32.xlu1 %v770_v10, %s1386_s11  ;;  %1355 = vrcp.f32 %v959_v45 }
0x1444   :  { %v1356_v46 = vpop.eup %1355 }
0x1445   :  { %v966_v49 = vmul.f32 %v1356_v46, %v964_v13 }
0x14a8   :  { %v969_v47 = vpop.permute.xlu1 %968 }
0x14a9   :  { %v971_v48 = vmul.f32 %v1356_v46, %v969_v47 }
0x14ab   :  { %973 = vrot.lane.b32.xlu0 %v971_v48, %s1387_s5 }
0x14af   :  { %984 = vrot.lane.b32.xlu0 %v346_v52, %s1386_s11 }
0x14b3   :  { %987 = vrot.lane.b32.xlu0 %v453_v12, %s1388_s2 }
0x151d   :  { %v974_v50 = vpop.permute.xlu0 %973 }
0x151e   :  { %v976_v53 = vadd.f32 %v974_v50, %v966_v49 }
0x1520   :  { %1357 = vtanh.f32 %v976_v53  ;;  %1022 = vrot.lane.b32.xlu0 %v976_v53, %s1388_s2 }
0x1521   :  { %v985_v56 = vpop.permute.xlu0 %984 }
0x1525   :  { %v988_v57 = vpop.permute.xlu0 %987 }
0x152a   :  { %v1358_v54 = vpop.eup %1357 }
0x152b   :  { %979 = vrot.lane.b32.xlu1 %v1358_v54, %s1386_s11 }
0x152f   :  { %995 = vrot.lane.b32.xlu1 %v877_v36, %s1388_s2 }
0x1592   :  { %v1023_v51 = vpop.permute.xlu0 %1022 }
0x1593   :  { %1026 = vst.msk [vmem:[#allocation2 - $0x6] sm:$0xc0] %vm1025_vm2, %v1023_v51 }
0x1594   :  { %1370 = shalt.err (!%p1367_p4)
}
0x1595   :  { %s1371_s19 = scalar_lea.hbm %s1615_s7, 32 }
0x1596   :  { %p1372_p5 = scmp.ne.s32.totalorder %s1615_s7, %s1371_s19  ;;  %p1375_p6 = scmp.lt.u32.totalorder %s1371_s19, %s1615_s7 }
0x1598   :  { %p1377_p7 = pnand %p1375_p6, %p1372_p5 }
0x159a   :  { %1380 = shalt.err (!%p1377_p7)
}
0x159b   :  { %1038 = dma.vmem_to_hbm [thread:$0]  %s1036_s15, 32, %s1615_s7, [#allocation3]   ;;  %v993_v52 = vpop.permute.xlu1 %992  ;;  %vm1002_vm3 = vcmask 523264   ;;  %v1001_v58 = vsel %vm53_vm0, %v1491_v33, %v985_v56  ;;  %vm1004_vm4 = vcmask 785408  }
0x159c   :  { %v1003_v59 = vsel %vm1002_vm3, %v1001_v58, %v988_v57  ;;  %v1006_v61 = vsel %vm53_vm0, %v1556_v55, %v993_v52 }
0x159d   :  { %v1005_v63 = vsel %vm1004_vm4, %v1003_v59, %v560_v34 }
0x159f   :  { %v980_v11 = vpop.permute.xlu1 %979 }
0x15a0   :  { %v982_v12 = vmul.f32 %v1356_v46, %v980_v11 }
0x15a2   :  { %v999_v60 = vrot.slane %v982_v12, 6 }
0x15a3   :  { %v996_v62 = vpop.permute.xlu1 %995 }
0x15a4   :  { %v1007_v1 = vsel %vm1002_vm3, %v1006_v61, %v996_v62 }
0x15a5   :  { %v1008_v7 = vsel %vm1004_vm4, %v1007_v1, %v999_v60 }
0x15a6   :  { %v1011_v0 = vcombine.low %v1005_v63, %v1008_v7 }
0x15a8   :  { %1064 = vst.sshfl [vmem:[%s1614_s6] sm:$0x33 pattern:$0x76325410] %v1011_v0 }
0x15a9   :  { %1381 = dma.done.wait [#allocation3], 32  }
0x15aa   :  { %1382 = vsyncadd [#allocation3], 4294967264 }
0x15ab   :  { %1044 = vsyncpa [#allocation3], 1 }

</bundles_post_ra>
